<compile_context>
chip_gen: v5e
topology: v5e:2x2
jax: 0.10.0
libtpu: 0.0.40
codegen_flags: <defaults>
</compile_context>

<pallas_src>
import jax
import jax.numpy as jnp
from jax.experimental import pallas as pl
from jax.experimental.pallas import tpu as pltpu

_LANES = 128


# --------------------------------------------------------------------------
# PE table construction — exact replica of the (modified) PyTorch __init__.
# Built ONCE at module init, already in the activation dtype.
# --------------------------------------------------------------------------
def make_positional_encoding_table(embed_dim, max_len=5000, dtype=jnp.float32):
    position = jnp.arange(0, max_len, dtype=jnp.float32)[:, None]            # (L, 1)
    div_even = jnp.power(
        10000.0, jnp.arange(0, embed_dim, 2, dtype=jnp.float32) / embed_dim)
    div_odd = jnp.power(
        10000.0, jnp.arange(1, embed_dim, 2, dtype=jnp.float32) / embed_dim)
    pe = jnp.zeros((max_len, embed_dim), dtype=jnp.float32)
    pe = pe.at[:, 0::2].set(jnp.sin(position * div_even))
    pe = pe.at[:, 1::2].set(jnp.cos(position * div_odd))
    return pe.astype(dtype)                                                   # (L, D)


# --------------------------------------------------------------------------
# Kernel: out = x + pe   (pe shared across the inner/batch grid axis)
# --------------------------------------------------------------------------
def _pe_add_kernel(x_ref, pe_ref, o_ref):
    # x_ref / o_ref: (tile, lanes)  -- batch dim squeezed by BlockSpec.
    # pe_ref:        (tile, lanes)  -- block index constant across inner batch steps.
    o_ref[...] = x_ref[...] + pe_ref[...]


def positional_encoding_pallas(x, pe, *, vmem_limit_bytes=48 * 1024 * 1024,
                               donate_x=True):
    """x: (B, S, D); pe: (max_len, D) table (ideally already in x.dtype)."""
    B, S, D = x.shape
    max_len, d_pe = pe.shape
    assert d_pe == D and S <= max_len, "sequence longer than the PE table"
    if pe.dtype != x.dtype:
        # Fallback only; prefer building the table in the activation dtype at init.
        pe = pe.astype(x.dtype)

    itemsize = jnp.dtype(x.dtype).itemsize
    row_mult = {4: 8, 2: 16, 1: 32}.get(itemsize, 8)        # sublane packing
    # Per grid step VMEM ~ (x + out + pe) blocks, each double-buffered = 6 blocks.
    budget = int(vmem_limit_bytes * 0.75)

    params = pltpu.CompilerParams(
        dimension_semantics=("parallel", "parallel"),
        vmem_limit_bytes=vmem_limit_bytes,
    )
    io_alias = {0: 0} if donate_x else {}

    def launch(x_in, pe_in, rows, lanes, tile):
        n_tiles = pl.cdiv(rows, tile)
        return pl.pallas_call(
            _pe_add_kernel,
            out_shape=jax.ShapeDtypeStruct((B, rows, lanes), x.dtype),
            # Leading axis = row tiles (megacore splits real work even at B=1);
            # innermost axis = batch, so the pe block is fetched once per row tile.
            grid=(n_tiles, B),
            in_specs=[
                pl.BlockSpec((None, tile, lanes), lambda r, b: (b, r, 0)),
                pl.BlockSpec((tile, lanes), lambda r, b: (r, 0)),
            ],
            out_specs=pl.BlockSpec((None, tile, lanes), lambda r, b: (b, r, 0)),
            compiler_params=params,
            input_output_aliases=io_alias,
        )(x_in, pe_in)

    # ---- Lane-dense path: view the (S, D) plane as rows of 128 lanes ----------
    R = (S * D) // _LANES
    if (S * D) % _LANES == 0 and (max_len * D) % _LANES == 0 and R >= row_mult:
        per_row = 6 * _LANES * itemsize
        tile_r = min(max(budget // per_row, 1), 16384)       # big tiles for v7x
        tile_r = max(row_mult, (tile_r // row_mult) * row_mult)
        if tile_r >= R:
            tile_r = R if R % row_mult == 0 else (R // row_mult) * row_mult
        # Flat-preserving reshapes (free).  The full table is passed; pe blocks past
        # row R read valid-but-unused rows and the matching out rows are never written.
        x_f = x.reshape(B, R, _LANES)
        pe_f = pe.reshape((max_len * D) // _LANES, _LANES)
        out = launch(x_f, pe_f, R, _LANES, tile_r)
        return out.reshape(B, S, D)

    # ---- Fallback: full-D blocks tiled over S (D < 128 -> masked stores) ------
    per_row = 6 * D * itemsize
    tile_s = min(max(budget // per_row, 1), 4096)
    tile_s = max(row_mult, (tile_s // row_mult) * row_mult)
    pe_in = pe
    if tile_s >= S:
        if S % row_mult == 0:
            tile_s = S
        elif S > row_mult:
            tile_s = (S // row_mult) * row_mult
        else:
            # Truly tiny S: make blocks equal the full dims of x and a sliced pe
            # (the slice is a few KB, only ever taken for toy shapes).
            tile_s = S
            pe_in = pe[:S]
    return launch(x, pe_in, S, D, tile_s)


# --------------------------------------------------------------------------
# Pure-JAX reference
# --------------------------------------------------------------------------
def positional_encoding_ref(x, pe):
    return x + pe[None, : x.shape[1], :].astype(x.dtype)


if __name__ == "__main__":
    max_len = 5000
    key = jax.random.PRNGKey(0)

    # Config 1: the module-example shape (fallback / full-D path, D=32).
    # Config 2: lane-dense path (D multiple of 128), the main optimized path.
    for (batch, seq, hidden) in ((2, 8, 32), (2, 8, 128)):
        kx, key = jax.random.split(key)
        x = jax.random.normal(kx, (batch, seq, hidden), dtype=jnp.float32)

        # Built once at "init", already in the activation dtype (no per-call cast).
        pe = make_positional_encoding_table(hidden, max_len=max_len, dtype=x.dtype)

        ref = positional_encoding_ref(x, pe)

        out = positional_encoding_pallas(x, pe)
        out = jax.block_until_ready(out)

        assert out.shape == x.shape
        assert jnp.allclose(out, ref, atol=1e-6, rtol=1e-6), "mismatch vs reference"

    print("KERNEL_OK")
</pallas_src>

<mosaic_0001>
module attributes {stable_mosaic.version = 11 : i64} {
  func.func @_pe_add_kernel(%arg0: i32, %arg1: i32, %arg2: memref<1x8x32xf32, #tpu.memory_space<vmem>>, %arg3: memref<8x32xf32, #tpu.memory_space<vmem>>, %arg4: memref<1x8x32xf32, #tpu.memory_space<vmem>>) attributes {dimension_semantics = [#tpu.dimension_semantics<parallel>, #tpu.dimension_semantics<parallel>], iteration_bounds = array<i64: 1, 2>, scalar_prefetch = 0 : i64, scratch_operands = 0 : i64, tpu.core_type = #tpu.core_type<tc>, window_params = [{transform_indices = @transform_0, window_bounds = array<i64: 1, 8, 32>}, {transform_indices = @transform_1, window_bounds = array<i64: 8, 32>}, {transform_indices = @transform_2, window_bounds = array<i64: 1, 8, 32>}]} {
    %c0 = arith.constant 0 : index
    %c0_0 = arith.constant 0 : index
    %c0_1 = arith.constant 0 : index
    %0 = vector.load %arg2[%c0, %c0_0, %c0_1] : memref<1x8x32xf32, #tpu.memory_space<vmem>>, vector<1x8x32xf32>
    %1 = vector.shape_cast %0 : vector<1x8x32xf32> to vector<8x32xf32>
    %c0_2 = arith.constant 0 : index
    %c0_3 = arith.constant 0 : index
    %2 = vector.load %arg3[%c0_2, %c0_3] : memref<8x32xf32, #tpu.memory_space<vmem>>, vector<8x32xf32>
    %3 = arith.addf %1, %2 : vector<8x32xf32>
    %c0_4 = arith.constant 0 : index
    %c0_5 = arith.constant 0 : index
    %c0_6 = arith.constant 0 : index
    %4 = vector.load %arg4[%c0_4, %c0_5, %c0_6] : memref<1x8x32xf32, #tpu.memory_space<vmem>>, vector<1x8x32xf32>
    %5 = vector.shape_cast %4 : vector<1x8x32xf32> to vector<8x32xf32>
    %6 = vector.shape_cast %3 : vector<8x32xf32> to vector<1x8x32xf32>
    tpu.vector_store %arg4[%c0_4, %c0_5, %c0_6], %6 {strides = array<i32>} : memref<1x8x32xf32, #tpu.memory_space<vmem>>, vector<1x8x32xf32>,
    return
  }
  func.func @transform_0(%arg0: i32, %arg1: i32) -> (i32, i32, i32) {
    %c0_i32 = arith.constant 0 : i32
    %c0_i32_0 = arith.constant 0 : i32
    return %arg1, %arg0, %c0_i32 : i32, i32, i32
  }
  func.func @transform_1(%arg0: i32, %arg1: i32) -> (i32, i32) {
    %c0_i32 = arith.constant 0 : i32
    %c0_i32_0 = arith.constant 0 : i32
    return %arg0, %c0_i32 : i32, i32
  }
  func.func @transform_2(%arg0: i32, %arg1: i32) -> (i32, i32, i32) {
    %c0_i32 = arith.constant 0 : i32
    %c0_i32_0 = arith.constant 0 : i32
    return %arg1, %arg0, %c0_i32 : i32, i32, i32
  }
}

</mosaic_0001>

<bundles_post_ra>
// kernel: tpu_custom_call.1
= control target key start
LH: loop header
LB: loop body
LE: loop exit
PB: predicated region body
PF: predicated region fallthrough
CT: control target
= control target key end

     0   :  { %7 = vsyncpa [#allocation3], 0  ;;  %s640_s0 = inlined_call_operand.hbm [shape: f32[2,8,32], index: 0, kind: input, shape index: {}, may-alias: {0,2}]   ;;  %s641_s1 = inlined_call_operand.vmem [shape: f32[5000,32], index: 1, kind: input, shape index: {}]   ;;  %s642_s2 = inlined_call_operand.hbm [shape: f32[2,8,32], index: 2, kind: output, shape index: {}, may-alias: {0,2}]  }
   0x1   :  { %9 = vsyncpa [#allocation3 + $0x1], 0 }
   0x2   :  { %10 = vsyncpa [#allocation4], 0 }
   0x3   :  { %12 = vsyncpa [#allocation4 + $0x1], 0  ;;  %s517_s9 = smov 0   ;;  %s519_s10 = smov 0  }
   0x4   :  { %s521_s11 = smov 0   ;;  %s523_s12 = smov 0  }
   0x5   :  { %s525_s13 = smov 0   ;;  %s527_s14 = smov 0  }
   0x6 LB: > { %s312_s15 = sadd.s32 4294967295, %s500_s14   ;;  %s313_s16 = sadd.s32 4294967294, %s500_s14   ;;  %s500_s14 = sphi %s527_s14, %s18_s14   ;;  %s496_s13 = sphi %s525_s13, %s651_s13   ;;  %s492_s12 = sphi %s523_s12, %s650_s12   ;;  %s488_s11 = sphi %s521_s11, %s649_s11   ;;  %s484_s10 = sphi %s519_s10, %s648_s10   ;;  %s480_s9 = sphi %s517_s9, %s647_s9  }
   0x7   : > { %s27_s17 = sadd.s32 1, %s496_s13  ;;  %s39_s18 = sadd.s32 1, %s488_s11 }
   0x8   : > { %p28_p0 = scmp.ge.s32.totalorder %s27_s17, 2  ;;  %p46_p1 = scmp.ne.s32.totalorder %s488_s11, %s484_s10 }
   0x9   : > { %p47_p2 = scmp.eq.s32.totalorder %s500_s14, 0  ;;  %p52_p3 = scmp.ne.s32.totalorder %s484_s10, %s480_s9 }
   0xa   : > { %s653_s17 = smov (%p28_p0, %s27_s17), 0  ;;  %p53_p5 = scmp.eq.s32.totalorder %s312_s15, 0 }
   0xb   : > { %p558_p4 = por %p47_p2, %p46_p1  ;;  %s34_s20 = ssub.s32 %s496_s13, %s653_s17 }
   0xc   : > { %p104_p6 = scmp.eq.s32.totalorder %s312_s15, 1  ;;  %p37_p7 = scmp.eq.s32.totalorder %s34_s20, 0 }
   0xd   : > { %p564_p8 = por %p53_p5, %p52_p3  ;;  %p110_p10 = scmp.eq.s32.totalorder %s313_s16, 1 }
   0xe   : > { %p568_p9 = por %p104_p6, %p46_p1  ;;  %p316_p12 = scmp.ge.s32.totalorder %s500_s14, 2 }
   0xf   : > { %s573_s23 = scalar_select %p37_p7, %s488_s11, %s39_s18  }
  0x10   : > { %p575_p11 = por %p110_p10, %p52_p3  ;;  %p338_p13 = scmp.lt.s32.totalorder %s500_s14, 2 }
  0x11   : > { %s137_s25 = sand.u32 1, %s488_s11   ;;  %s318_s27 = sshll.u32 %s496_s13, 3 }
  0x12   : > { %s317_s26 = sshll.u32 %s137_s25, 3  ;;  %s146_s30 = scalar_lea.hbm %s640_s0, %s318_s27 }
  0x13   : > { %s141_s3 = scalar_lea.vmem [#allocation2], %s317_s26  ;;  %s148_s5 = sshll.u32 %s146_s30, 4  ;;  %s149_s5 = int_to_ptr.hbm [resolvable:$true] %s148_s5 }
  0x14   : > { %s150_s4 = sshll.u32 %s141_s3, 4  ;;  %p331_p0 = pnand %p338_p13, %p558_p4  ;;  %s151_s4 = int_to_ptr.vmem [resolvable:$true] %s150_s4 }
  0x15   : > { %p319_p1 = scmp.ge.s32.totalorder %s500_s14, 1  ;;  %p155_p2 = scmp.lt.s32.totalorder %s500_s14, 3 }
  0x16   : > { %s138_s6 = scalar_lea.sflag [#allocation3], %s137_s25 }
  0x17   : > { %333 = dma.hbm_to_vmem [thread:$0]  (!%p331_p0), %s149_s5, 128, %s151_s4, %s138_s6  }
  0x18   : > { %p156_p3 = pnand %p319_p1, %p155_p2 }
  0x19   : > { %s591_s7 = sand.u32 (!%p156_p3), 1, %s484_s10  }
  0x1a   : > { %159 = sbr.rel (%p156_p3) target bundleno = 47 (0x2f), region = 28  ;;  %s320_s8 = sshll.u32 (!%p156_p3), %s591_s7, 3 }
  0x1b   : > { %s162_s15 = scalar_lea.sflag (!%p156_p3), [#allocation3], %s591_s7  ;;  %s165_s16 = scalar_lea.vmem (!%p156_p3), [#allocation2], %s320_s8 }
  0x1f   : > { %471 = dma.done.wait (%p564_p8), %s162_s15, 128  }
  0x20   : > { %473 = vsyncadd (%p564_p8), %s162_s15, 4294967168  ;;  %s323_s18 = sshll.u32 %s492_s12, 3  ;;  %s190_s26 = scalar_lea.vmem [#allocation5], %s320_s8  ;;  %v195_v0 = vld [vmem:[%s165_s16] sm:$0xff]  ;;  %vm198_vm0 = vcmask 261120  }
  0x21   : > { %s212_s25 = scalar_lea.hbm %s642_s2, %s323_s18  ;;  %s214_s27 = sshll.u32 %s190_s26, 4  ;;  %v196_v1 = vld [vmem:[%s641_s1] sm:$0xff]  ;;  %s215_s27 = int_to_ptr.vmem [resolvable:$true] %s214_s27 }
  0x22   : > { %s216_s28 = sshll.u32 %s212_s25, 4  ;;  %v197_v2 = vadd.f32 %v196_v1, %v195_v0  ;;  %s201_s21 = scalar_lea.sflag [#allocation4], %s591_s7  ;;  %s217_s28 = int_to_ptr.hbm [resolvable:$true] %s216_s28 }
  0x23   : > { %s432_s12 = sshra.s32 %s217_s28, 4  ;;  %s438_s6 = scalar_lea.hbm %s642_s2, 16  ;;  %s433_s12 = int_to_ptr.hbm [resolvable:$true] %s432_s12 }
  0x24   : > { %199 = vst.msk [vmem:[%s190_s26] sm:$0xff] %vm198_vm0, %v197_v2  ;;  %s434_s3 = scalar_lea.hbm %s433_s12, 8  ;;  %p439_p7 = scmp.lt.s32.totalorder %s433_s12, %s642_s2 }
  0x25   : > { %p435_p4 = scmp.ne.s32.totalorder %s433_s12, %s434_s3  ;;  %p440_p8 = scmp.lt.s32.totalorder %s438_s6, %s434_s3 }
  0x27   : > { %p436_p5 = pnand %p435_p4, %p568_p9  ;;  %p441_p10 = por %p440_p8, %p439_p7 }
  0x29   : > { %p437_p6 = pneg %p436_p5 }
  0x2b   : > { %p442_p13 = pnand %p441_p10, %p437_p6 }
  0x2d   : > { %445 = shalt.err (!%p442_p13)
}
  0x2e   : > { %328 = dma.vmem_to_hbm [thread:$0]  (%p568_p9), %s215_s27, 128, %s217_s28, %s201_s21  }
  0x2f PF: > { %s228_s7 = sand.u32 1, %s480_s9   ;;  %p335_p0 = pnand %p316_p12, %p575_p11 }
  0x30   : > { %s229_s16 = scalar_lea.sflag [#allocation4], %s228_s7 }
  0x31   : > { %p336_p1 = pneg %p335_p0 }
  0x33   : > { %475 = dma.done.wait (%p336_p1), %s229_s16, 128  }
  0x34   : > { %477 = vsyncadd (%p336_p1), %s229_s16, 4294967168  ;;  %s18_s14 = sadd.s32 1, %s500_s14   ;;  %s647_s9 = smov %s484_s10 }
  0x35   : > { %p15_p2 = scmp.ge.s32.totalorder %s18_s14, 4   ;;  %s648_s10 = smov %s488_s11 }
  0x36   : > { %s649_s11 = smov %s573_s23  ;;  %s650_s12 = smov %s496_s13 }
  0x37   : > { %s651_s13 = smov %s653_s17  ;;  %17 = sbr.rel (!%p15_p2) target bundleno = 6 (0x6), region = 76 }
  0x3c   :  { %235 = vsyncpa [#allocation3], 1 }
  0x3d   :  { %237 = vsyncpa [#allocation3 + $0x1], 1 }
  0x3e   :  { %238 = vsyncpa [#allocation4], 1 }
  0x3f   :  { %240 = vsyncpa [#allocation4 + $0x1], 1 }

</bundles_post_ra>
